<compile_context>
chip_gen: v7x
topology: tpu7x:2x2x1
jax: 0.10.0
libtpu: 0.0.40
codegen_flags: <defaults>
</compile_context>

<pallas_src>
import jax
import jax.numpy as jnp
from jax.experimental import pallas as pl
from jax.experimental.pallas import tpu as pltpu


def _relu_kernel(x_ref, o_ref):
    # Elementwise max against an immediate zero on the VPU (no broadcast tile).
    o_ref[...] = jnp.maximum(x_ref[...], 0.0)


# Whole-array (gridless) path while input + output comfortably fit in VMEM.
_WHOLE_ARRAY_BYTES = 1 << 20          # 1 MiB
_TILE_ROWS = 512                      # (512, 128) f32 tile = 256 KiB


def _relu_whole(x: jax.Array) -> jax.Array:
    """Single-block ReLU: whole tensor resident in VMEM, no grid, no reshape."""
    return pl.pallas_call(
        _relu_kernel,
        out_shape=jax.ShapeDtypeStruct(x.shape, x.dtype),
        in_specs=[pl.BlockSpec(memory_space=pltpu.MemorySpace.VMEM)],
        out_specs=pl.BlockSpec(memory_space=pltpu.MemorySpace.VMEM),
        input_output_aliases={0: 0},   # ReLU(inplace=True): reuse input buffer
    )(x)


def _relu_tiled(x: jax.Array) -> jax.Array:
    """Lane-dense tiled ReLU for activations too large for a single block."""
    total = x.size
    flat = x.reshape(-1)
    pad = (-total) % 128
    if pad:
        # Pad up so the last dim is a full 128 lanes (unmasked vst), then
        # slice the pad back off below.
        flat = jnp.pad(flat, (0, pad))
    rows = flat.size // 128
    x2d = flat.reshape(rows, 128)
    out2d = pl.pallas_call(
        _relu_kernel,
        out_shape=jax.ShapeDtypeStruct((rows, 128), x.dtype),
        grid=(pl.cdiv(rows, _TILE_ROWS),),
        in_specs=[pl.BlockSpec((_TILE_ROWS, 128), lambda i: (i, 0))],
        out_specs=pl.BlockSpec((_TILE_ROWS, 128), lambda i: (i, 0)),
        input_output_aliases={0: 0},
        compiler_params=pltpu.CompilerParams(
            dimension_semantics=("parallel",)),
    )(x2d)
    out_flat = out2d.reshape(-1)
    if pad:
        out_flat = out_flat[:total]
    return out_flat.reshape(x.shape)


def relu_pallas(x: jax.Array) -> jax.Array:
    """ReLU on an NCHW activation via Pallas TPU kernels."""
    if x.size * x.dtype.itemsize <= _WHOLE_ARRAY_BYTES:
        return _relu_whole(x)
    return _relu_tiled(x)


if __name__ == "__main__":
    key = jax.random.PRNGKey(0)

    # Matches torch.randn(torch.Size([1, 128, 7, 7])) from the module.
    x535 = jax.random.normal(key, (1, 128, 7, 7), dtype=jnp.float32)
    ref = jnp.maximum(x535, 0.0)  # reference BEFORE donating the input

    # Donate the input at the jit boundary; the pallas_call aliases it to the
    # output, mirroring ReLU(inplace=True).
    relu_jit = jax.jit(relu_pallas, donate_argnums=0)
    x536 = relu_jit(x535)
    jax.block_until_ready(x536)

    assert x536.shape == (1, 128, 7, 7)
    assert x536.dtype == jnp.float32
    assert jnp.allclose(x536, ref), "ReLU mismatch (whole-array path)"

    # Sanity-check the lane-dense tiled path on a larger activation.
    x_big = jax.random.normal(
        jax.random.PRNGKey(1), (4, 128, 32, 32), dtype=jnp.float32)
    ref_big = jnp.maximum(x_big, 0.0)
    y_big = jax.jit(relu_pallas)(x_big)
    jax.block_until_ready(y_big)
    assert jnp.allclose(y_big, ref_big), "ReLU mismatch (tiled path)"

    print("KERNEL_OK")
</pallas_src>

<mosaic_0001>
module attributes {stable_mosaic.version = 11 : i64} {
  func.func @_relu_kernel(%arg0: memref<1x128x7x7xf32, #tpu.memory_space<vmem>>, %arg1: memref<1x128x7x7xf32, #tpu.memory_space<vmem>>) attributes {dimension_semantics = [], scalar_prefetch = 0 : i64, scratch_operands = 0 : i64, tpu.core_type = #tpu.core_type<tc>} {
    %c0 = arith.constant 0 : index
    %c0_0 = arith.constant 0 : index
    %c0_1 = arith.constant 0 : index
    %c0_2 = arith.constant 0 : index
    %0 = vector.load %arg0[%c0, %c0_0, %c0_1, %c0_2] : memref<1x128x7x7xf32, #tpu.memory_space<vmem>>, vector<1x128x7x7xf32>
    %cst = arith.constant 0.000000e+00 : f32
    %1 = vector.broadcast %cst : f32 to vector<1x128x7x7xf32>
    %2 = arith.maximumf %0, %1 : vector<1x128x7x7xf32>
    %c0_3 = arith.constant 0 : index
    %c0_4 = arith.constant 0 : index
    %c0_5 = arith.constant 0 : index
    %c0_6 = arith.constant 0 : index
    %3 = vector.load %arg1[%c0_3, %c0_4, %c0_5, %c0_6] : memref<1x128x7x7xf32, #tpu.memory_space<vmem>>, vector<1x128x7x7xf32>
    tpu.vector_store %arg1[%c0_3, %c0_4, %c0_5, %c0_6], %2 {strides = array<i32>} : memref<1x128x7x7xf32, #tpu.memory_space<vmem>>, vector<1x128x7x7xf32>,
    return
  }
}

</mosaic_0001>

<bundles_post_ra>
// kernel: relu_pallas.1
= control target key start
LH: loop header
LB: loop body
LE: loop exit
PB: predicated region body
PF: predicated region fallthrough
CT: control target
= control target key end

     0   :  { %vm264_vm0 = vcmask 55296   ;;  %s1303_s0 = inlined_call_operand.vmem [shape: f32[1,128,7,7], index: 0, kind: input, shape index: {}, may-alias: {0,1}]   ;;  %s1304_s1 = inlined_call_operand.vmem [shape: f32[1,128,7,7], index: 1, kind: output, shape index: {}, may-alias: {0,1}]  }
   0x1   :  { %v8_v0 = vld [vmem:[%s1303_s0] sm:$0x7f]  ;;  %v9_v1 = vld [vmem:[%s1303_s0 + $0x8] sm:$0x7f]  ;;  %v10_v2 = vld [vmem:[%s1303_s0 + $0x10] sm:$0x7f] }
   0x2   :  { %v136_v3 = vmax.f32 %v8_v0, 0.0  ;;  %v137_v4 = vmax.f32 %v9_v1, 0.0  ;;  %v138_v5 = vmax.f32 %v10_v2, 0.0  ;;  %v11_v6 = vld [vmem:[%s1303_s0 + $0x18] sm:$0x7f] }
   0x3   :  { %v139_v7 = vmax.f32 %v11_v6, 0.0  ;;  %v12_v8 = vld [vmem:[%s1303_s0 + $0x20] sm:$0x7f]  ;;  %v13_v9 = vld [vmem:[%s1303_s0 + $0x28] sm:$0x7f] }
   0x4   :  { %265 = vst.msk [vmem:[%s1304_s1] sm:$0x7f] %vm264_vm0, %v136_v3  ;;  %266 = vst.msk [vmem:[%s1304_s1 + $0x8] sm:$0x7f] %vm264_vm0, %v137_v4  ;;  %v140_v10 = vmax.f32 %v12_v8, 0.0  ;;  %v141_v11 = vmax.f32 %v13_v9, 0.0 }
   0x5   :  { %267 = vst.msk [vmem:[%s1304_s1 + $0x10] sm:$0x7f] %vm264_vm0, %v138_v5 }
   0xc   :  { %v14_v12 = vld [vmem:[%s1303_s0 + $0x30] sm:$0x7f]  ;;  %v15_v13 = vld [vmem:[%s1303_s0 + $0x38] sm:$0x7f] }
   0xd   :  { %268 = vst.msk [vmem:[%s1304_s1 + $0x18] sm:$0x7f] %vm264_vm0, %v139_v7  ;;  %v142_v14 = vmax.f32 %v14_v12, 0.0  ;;  %v143_v15 = vmax.f32 %v15_v13, 0.0 }
  0x14   :  { %v16_v16 = vld [vmem:[%s1303_s0 + $0x40] sm:$0x7f]  ;;  %v17_v17 = vld [vmem:[%s1303_s0 + $0x48] sm:$0x7f] }
  0x15   :  { %269 = vst.msk [vmem:[%s1304_s1 + $0x20] sm:$0x7f] %vm264_vm0, %v140_v10  ;;  %270 = vst.msk [vmem:[%s1304_s1 + $0x28] sm:$0x7f] %vm264_vm0, %v141_v11  ;;  %v144_v18 = vmax.f32 %v16_v16, 0.0  ;;  %v145_v19 = vmax.f32 %v17_v17, 0.0 }
  0x1c   :  { %v18_v20 = vld [vmem:[%s1303_s0 + $0x50] sm:$0x7f]  ;;  %v19_v21 = vld [vmem:[%s1303_s0 + $0x58] sm:$0x7f] }
  0x1d   :  { %271 = vst.msk [vmem:[%s1304_s1 + $0x30] sm:$0x7f] %vm264_vm0, %v142_v14  ;;  %272 = vst.msk [vmem:[%s1304_s1 + $0x38] sm:$0x7f] %vm264_vm0, %v143_v15  ;;  %v146_v22 = vmax.f32 %v18_v20, 0.0  ;;  %v147_v23 = vmax.f32 %v19_v21, 0.0 }
  0x24   :  { %v20_v24 = vld [vmem:[%s1303_s0 + $0x60] sm:$0x7f]  ;;  %v21_v25 = vld [vmem:[%s1303_s0 + $0x68] sm:$0x7f] }
  0x25   :  { %273 = vst.msk [vmem:[%s1304_s1 + $0x40] sm:$0x7f] %vm264_vm0, %v144_v18  ;;  %274 = vst.msk [vmem:[%s1304_s1 + $0x48] sm:$0x7f] %vm264_vm0, %v145_v19  ;;  %v148_v26 = vmax.f32 %v20_v24, 0.0  ;;  %v149_v27 = vmax.f32 %v21_v25, 0.0 }
  0x2c   :  { %v22_v28 = vld [vmem:[%s1303_s0 + $0x70] sm:$0x7f]  ;;  %v23_v29 = vld [vmem:[%s1303_s0 + $0x78] sm:$0x7f] }
  0x2d   :  { %275 = vst.msk [vmem:[%s1304_s1 + $0x50] sm:$0x7f] %vm264_vm0, %v146_v22  ;;  %276 = vst.msk [vmem:[%s1304_s1 + $0x58] sm:$0x7f] %vm264_vm0, %v147_v23  ;;  %v150_v30 = vmax.f32 %v22_v28, 0.0  ;;  %v151_v31 = vmax.f32 %v23_v29, 0.0 }
  0x34   :  { %v24_v32 = vld [vmem:[%s1303_s0 + $0x80] sm:$0x7f]  ;;  %v25_v33 = vld [vmem:[%s1303_s0 + $0x88] sm:$0x7f] }
  0x35   :  { %277 = vst.msk [vmem:[%s1304_s1 + $0x60] sm:$0x7f] %vm264_vm0, %v148_v26  ;;  %278 = vst.msk [vmem:[%s1304_s1 + $0x68] sm:$0x7f] %vm264_vm0, %v149_v27  ;;  %v152_v34 = vmax.f32 %v24_v32, 0.0  ;;  %v153_v35 = vmax.f32 %v25_v33, 0.0 }
  0x3c   :  { %v26_v36 = vld [vmem:[%s1303_s0 + $0x90] sm:$0x7f]  ;;  %v27_v37 = vld [vmem:[%s1303_s0 + $0x98] sm:$0x7f] }
  0x3d   :  { %279 = vst.msk [vmem:[%s1304_s1 + $0x70] sm:$0x7f] %vm264_vm0, %v150_v30  ;;  %280 = vst.msk [vmem:[%s1304_s1 + $0x78] sm:$0x7f] %vm264_vm0, %v151_v31  ;;  %v154_v38 = vmax.f32 %v26_v36, 0.0  ;;  %v155_v39 = vmax.f32 %v27_v37, 0.0 }
  0x44   :  { %v28_v40 = vld [vmem:[%s1303_s0 + $0xa0] sm:$0x7f]  ;;  %v29_v41 = vld [vmem:[%s1303_s0 + $0xa8] sm:$0x7f] }
  0x45   :  { %281 = vst.msk [vmem:[%s1304_s1 + $0x80] sm:$0x7f] %vm264_vm0, %v152_v34  ;;  %282 = vst.msk [vmem:[%s1304_s1 + $0x88] sm:$0x7f] %vm264_vm0, %v153_v35  ;;  %v156_v42 = vmax.f32 %v28_v40, 0.0  ;;  %v157_v43 = vmax.f32 %v29_v41, 0.0 }
  0x4c   :  { %v30_v44 = vld [vmem:[%s1303_s0 + $0xb0] sm:$0x7f]  ;;  %v31_v45 = vld [vmem:[%s1303_s0 + $0xb8] sm:$0x7f] }
  0x4d   :  { %283 = vst.msk [vmem:[%s1304_s1 + $0x90] sm:$0x7f] %vm264_vm0, %v154_v38  ;;  %284 = vst.msk [vmem:[%s1304_s1 + $0x98] sm:$0x7f] %vm264_vm0, %v155_v39  ;;  %v158_v46 = vmax.f32 %v30_v44, 0.0  ;;  %v159_v47 = vmax.f32 %v31_v45, 0.0 }
  0x54   :  { %v32_v48 = vld [vmem:[%s1303_s0 + $0xc0] sm:$0x7f]  ;;  %v33_v49 = vld [vmem:[%s1303_s0 + $0xc8] sm:$0x7f] }
  0x55   :  { %285 = vst.msk [vmem:[%s1304_s1 + $0xa0] sm:$0x7f] %vm264_vm0, %v156_v42  ;;  %286 = vst.msk [vmem:[%s1304_s1 + $0xa8] sm:$0x7f] %vm264_vm0, %v157_v43  ;;  %v160_v50 = vmax.f32 %v32_v48, 0.0  ;;  %v161_v51 = vmax.f32 %v33_v49, 0.0 }
  0x5c   :  { %v34_v52 = vld [vmem:[%s1303_s0 + $0xd0] sm:$0x7f]  ;;  %v35_v53 = vld [vmem:[%s1303_s0 + $0xd8] sm:$0x7f] }
  0x5d   :  { %287 = vst.msk [vmem:[%s1304_s1 + $0xb0] sm:$0x7f] %vm264_vm0, %v158_v46  ;;  %288 = vst.msk [vmem:[%s1304_s1 + $0xb8] sm:$0x7f] %vm264_vm0, %v159_v47  ;;  %v162_v54 = vmax.f32 %v34_v52, 0.0  ;;  %v163_v55 = vmax.f32 %v35_v53, 0.0 }
  0x64   :  { %v36_v56 = vld [vmem:[%s1303_s0 + $0xe0] sm:$0x7f]  ;;  %v37_v57 = vld [vmem:[%s1303_s0 + $0xe8] sm:$0x7f] }
  0x65   :  { %289 = vst.msk [vmem:[%s1304_s1 + $0xc0] sm:$0x7f] %vm264_vm0, %v160_v50  ;;  %290 = vst.msk [vmem:[%s1304_s1 + $0xc8] sm:$0x7f] %vm264_vm0, %v161_v51  ;;  %v164_v58 = vmax.f32 %v36_v56, 0.0  ;;  %v165_v59 = vmax.f32 %v37_v57, 0.0 }
  0x6c   :  { %v38_v60 = vld [vmem:[%s1303_s0 + $0xf0] sm:$0x7f]  ;;  %v39_v61 = vld [vmem:[%s1303_s0 + $0xf8] sm:$0x7f] }
  0x6d   :  { %291 = vst.msk [vmem:[%s1304_s1 + $0xd0] sm:$0x7f] %vm264_vm0, %v162_v54  ;;  %292 = vst.msk [vmem:[%s1304_s1 + $0xd8] sm:$0x7f] %vm264_vm0, %v163_v55  ;;  %v166_v62 = vmax.f32 %v38_v60, 0.0  ;;  %v167_v63 = vmax.f32 %v39_v61, 0.0 }
  0x74   :  { %v40_v0 = vld [vmem:[%s1303_s0 + $0x100] sm:$0x7f]  ;;  %v41_v1 = vld [vmem:[%s1303_s0 + $0x108] sm:$0x7f] }
  0x75   :  { %293 = vst.msk [vmem:[%s1304_s1 + $0xe0] sm:$0x7f] %vm264_vm0, %v164_v58  ;;  %294 = vst.msk [vmem:[%s1304_s1 + $0xe8] sm:$0x7f] %vm264_vm0, %v165_v59  ;;  %v168_v2 = vmax.f32 %v40_v0, 0.0  ;;  %v169_v3 = vmax.f32 %v41_v1, 0.0 }
  0x7c   :  { %v42_v4 = vld [vmem:[%s1303_s0 + $0x110] sm:$0x7f]  ;;  %v43_v5 = vld [vmem:[%s1303_s0 + $0x118] sm:$0x7f] }
  0x7d   :  { %295 = vst.msk [vmem:[%s1304_s1 + $0xf0] sm:$0x7f] %vm264_vm0, %v166_v62  ;;  %296 = vst.msk [vmem:[%s1304_s1 + $0xf8] sm:$0x7f] %vm264_vm0, %v167_v63  ;;  %v170_v6 = vmax.f32 %v42_v4, 0.0  ;;  %v171_v7 = vmax.f32 %v43_v5, 0.0 }
  0x84   :  { %v44_v8 = vld [vmem:[%s1303_s0 + $0x120] sm:$0x7f]  ;;  %v45_v9 = vld [vmem:[%s1303_s0 + $0x128] sm:$0x7f] }
  0x85   :  { %297 = vst.msk [vmem:[%s1304_s1 + $0x100] sm:$0x7f] %vm264_vm0, %v168_v2  ;;  %298 = vst.msk [vmem:[%s1304_s1 + $0x108] sm:$0x7f] %vm264_vm0, %v169_v3  ;;  %v172_v10 = vmax.f32 %v44_v8, 0.0  ;;  %v173_v11 = vmax.f32 %v45_v9, 0.0 }
  0x8c   :  { %v46_v12 = vld [vmem:[%s1303_s0 + $0x130] sm:$0x7f]  ;;  %v47_v13 = vld [vmem:[%s1303_s0 + $0x138] sm:$0x7f] }
  0x8d   :  { %299 = vst.msk [vmem:[%s1304_s1 + $0x110] sm:$0x7f] %vm264_vm0, %v170_v6  ;;  %300 = vst.msk [vmem:[%s1304_s1 + $0x118] sm:$0x7f] %vm264_vm0, %v171_v7  ;;  %v174_v14 = vmax.f32 %v46_v12, 0.0  ;;  %v175_v15 = vmax.f32 %v47_v13, 0.0 }
  0x94   :  { %v48_v16 = vld [vmem:[%s1303_s0 + $0x140] sm:$0x7f]  ;;  %v49_v17 = vld [vmem:[%s1303_s0 + $0x148] sm:$0x7f] }
  0x95   :  { %301 = vst.msk [vmem:[%s1304_s1 + $0x120] sm:$0x7f] %vm264_vm0, %v172_v10  ;;  %302 = vst.msk [vmem:[%s1304_s1 + $0x128] sm:$0x7f] %vm264_vm0, %v173_v11  ;;  %v176_v18 = vmax.f32 %v48_v16, 0.0  ;;  %v177_v19 = vmax.f32 %v49_v17, 0.0 }
  0x9c   :  { %v50_v20 = vld [vmem:[%s1303_s0 + $0x150] sm:$0x7f]  ;;  %v51_v21 = vld [vmem:[%s1303_s0 + $0x158] sm:$0x7f] }
  0x9d   :  { %303 = vst.msk [vmem:[%s1304_s1 + $0x130] sm:$0x7f] %vm264_vm0, %v174_v14  ;;  %304 = vst.msk [vmem:[%s1304_s1 + $0x138] sm:$0x7f] %vm264_vm0, %v175_v15  ;;  %v178_v22 = vmax.f32 %v50_v20, 0.0  ;;  %v179_v23 = vmax.f32 %v51_v21, 0.0 }
  0xa4   :  { %v52_v24 = vld [vmem:[%s1303_s0 + $0x160] sm:$0x7f]  ;;  %v53_v25 = vld [vmem:[%s1303_s0 + $0x168] sm:$0x7f] }
  0xa5   :  { %305 = vst.msk [vmem:[%s1304_s1 + $0x140] sm:$0x7f] %vm264_vm0, %v176_v18  ;;  %306 = vst.msk [vmem:[%s1304_s1 + $0x148] sm:$0x7f] %vm264_vm0, %v177_v19  ;;  %v180_v26 = vmax.f32 %v52_v24, 0.0  ;;  %v181_v27 = vmax.f32 %v53_v25, 0.0 }
  0xac   :  { %v54_v28 = vld [vmem:[%s1303_s0 + $0x170] sm:$0x7f]  ;;  %v55_v29 = vld [vmem:[%s1303_s0 + $0x178] sm:$0x7f] }
  0xad   :  { %307 = vst.msk [vmem:[%s1304_s1 + $0x150] sm:$0x7f] %vm264_vm0, %v178_v22  ;;  %308 = vst.msk [vmem:[%s1304_s1 + $0x158] sm:$0x7f] %vm264_vm0, %v179_v23  ;;  %v182_v30 = vmax.f32 %v54_v28, 0.0  ;;  %v183_v31 = vmax.f32 %v55_v29, 0.0 }
  0xb4   :  { %v56_v32 = vld [vmem:[%s1303_s0 + $0x180] sm:$0x7f]  ;;  %v57_v33 = vld [vmem:[%s1303_s0 + $0x188] sm:$0x7f] }
  0xb5   :  { %309 = vst.msk [vmem:[%s1304_s1 + $0x160] sm:$0x7f] %vm264_vm0, %v180_v26  ;;  %310 = vst.msk [vmem:[%s1304_s1 + $0x168] sm:$0x7f] %vm264_vm0, %v181_v27  ;;  %v184_v34 = vmax.f32 %v56_v32, 0.0  ;;  %v185_v35 = vmax.f32 %v57_v33, 0.0 }
  0xbc   :  { %v58_v36 = vld [vmem:[%s1303_s0 + $0x190] sm:$0x7f]  ;;  %v59_v37 = vld [vmem:[%s1303_s0 + $0x198] sm:$0x7f] }
  0xbd   :  { %311 = vst.msk [vmem:[%s1304_s1 + $0x170] sm:$0x7f] %vm264_vm0, %v182_v30  ;;  %312 = vst.msk [vmem:[%s1304_s1 + $0x178] sm:$0x7f] %vm264_vm0, %v183_v31  ;;  %v186_v38 = vmax.f32 %v58_v36, 0.0  ;;  %v187_v39 = vmax.f32 %v59_v37, 0.0 }
  0xc4   :  { %v60_v40 = vld [vmem:[%s1303_s0 + $0x1a0] sm:$0x7f]  ;;  %v61_v41 = vld [vmem:[%s1303_s0 + $0x1a8] sm:$0x7f] }
  0xc5   :  { %313 = vst.msk [vmem:[%s1304_s1 + $0x180] sm:$0x7f] %vm264_vm0, %v184_v34  ;;  %314 = vst.msk [vmem:[%s1304_s1 + $0x188] sm:$0x7f] %vm264_vm0, %v185_v35  ;;  %v188_v42 = vmax.f32 %v60_v40, 0.0  ;;  %v189_v43 = vmax.f32 %v61_v41, 0.0 }
  0xcc   :  { %v62_v44 = vld [vmem:[%s1303_s0 + $0x1b0] sm:$0x7f]  ;;  %v63_v45 = vld [vmem:[%s1303_s0 + $0x1b8] sm:$0x7f] }
  0xcd   :  { %315 = vst.msk [vmem:[%s1304_s1 + $0x190] sm:$0x7f] %vm264_vm0, %v186_v38  ;;  %316 = vst.msk [vmem:[%s1304_s1 + $0x198] sm:$0x7f] %vm264_vm0, %v187_v39  ;;  %v190_v46 = vmax.f32 %v62_v44, 0.0  ;;  %v191_v47 = vmax.f32 %v63_v45, 0.0 }
  0xd4   :  { %v64_v48 = vld [vmem:[%s1303_s0 + $0x1c0] sm:$0x7f]  ;;  %v65_v49 = vld [vmem:[%s1303_s0 + $0x1c8] sm:$0x7f] }
  0xd5   :  { %317 = vst.msk [vmem:[%s1304_s1 + $0x1a0] sm:$0x7f] %vm264_vm0, %v188_v42  ;;  %318 = vst.msk [vmem:[%s1304_s1 + $0x1a8] sm:$0x7f] %vm264_vm0, %v189_v43  ;;  %v192_v50 = vmax.f32 %v64_v48, 0.0  ;;  %v193_v51 = vmax.f32 %v65_v49, 0.0 }
  0xdc   :  { %v66_v52 = vld [vmem:[%s1303_s0 + $0x1d0] sm:$0x7f]  ;;  %v67_v53 = vld [vmem:[%s1303_s0 + $0x1d8] sm:$0x7f] }
  0xdd   :  { %319 = vst.msk [vmem:[%s1304_s1 + $0x1b0] sm:$0x7f] %vm264_vm0, %v190_v46  ;;  %320 = vst.msk [vmem:[%s1304_s1 + $0x1b8] sm:$0x7f] %vm264_vm0, %v191_v47  ;;  %v194_v54 = vmax.f32 %v66_v52, 0.0  ;;  %v195_v55 = vmax.f32 %v67_v53, 0.0 }
  0xe4   :  { %v68_v56 = vld [vmem:[%s1303_s0 + $0x1e0] sm:$0x7f]  ;;  %v69_v57 = vld [vmem:[%s1303_s0 + $0x1e8] sm:$0x7f] }
  0xe5   :  { %321 = vst.msk [vmem:[%s1304_s1 + $0x1c0] sm:$0x7f] %vm264_vm0, %v192_v50  ;;  %322 = vst.msk [vmem:[%s1304_s1 + $0x1c8] sm:$0x7f] %vm264_vm0, %v193_v51  ;;  %v196_v58 = vmax.f32 %v68_v56, 0.0  ;;  %v197_v59 = vmax.f32 %v69_v57, 0.0 }
  0xec   :  { %v70_v60 = vld [vmem:[%s1303_s0 + $0x1f0] sm:$0x7f]  ;;  %v71_v61 = vld [vmem:[%s1303_s0 + $0x1f8] sm:$0x7f] }
  0xed   :  { %323 = vst.msk [vmem:[%s1304_s1 + $0x1d0] sm:$0x7f] %vm264_vm0, %v194_v54  ;;  %324 = vst.msk [vmem:[%s1304_s1 + $0x1d8] sm:$0x7f] %vm264_vm0, %v195_v55  ;;  %v198_v62 = vmax.f32 %v70_v60, 0.0  ;;  %v199_v63 = vmax.f32 %v71_v61, 0.0 }
  0xf4   :  { %v72_v0 = vld [vmem:[%s1303_s0 + $0x200] sm:$0x7f]  ;;  %v73_v1 = vld [vmem:[%s1303_s0 + $0x208] sm:$0x7f] }
  0xf5   :  { %325 = vst.msk [vmem:[%s1304_s1 + $0x1e0] sm:$0x7f] %vm264_vm0, %v196_v58  ;;  %326 = vst.msk [vmem:[%s1304_s1 + $0x1e8] sm:$0x7f] %vm264_vm0, %v197_v59  ;;  %v200_v2 = vmax.f32 %v72_v0, 0.0  ;;  %v201_v3 = vmax.f32 %v73_v1, 0.0 }
  0xfc   :  { %v74_v4 = vld [vmem:[%s1303_s0 + $0x210] sm:$0x7f]  ;;  %v75_v5 = vld [vmem:[%s1303_s0 + $0x218] sm:$0x7f] }
  0xfd   :  { %327 = vst.msk [vmem:[%s1304_s1 + $0x1f0] sm:$0x7f] %vm264_vm0, %v198_v62  ;;  %328 = vst.msk [vmem:[%s1304_s1 + $0x1f8] sm:$0x7f] %vm264_vm0, %v199_v63  ;;  %v202_v6 = vmax.f32 %v74_v4, 0.0  ;;  %v203_v7 = vmax.f32 %v75_v5, 0.0 }
 0x104   :  { %v76_v8 = vld [vmem:[%s1303_s0 + $0x220] sm:$0x7f]  ;;  %v77_v9 = vld [vmem:[%s1303_s0 + $0x228] sm:$0x7f] }
 0x105   :  { %329 = vst.msk [vmem:[%s1304_s1 + $0x200] sm:$0x7f] %vm264_vm0, %v200_v2  ;;  %330 = vst.msk [vmem:[%s1304_s1 + $0x208] sm:$0x7f] %vm264_vm0, %v201_v3  ;;  %v204_v10 = vmax.f32 %v76_v8, 0.0  ;;  %v205_v11 = vmax.f32 %v77_v9, 0.0 }
 0x10c   :  { %v78_v12 = vld [vmem:[%s1303_s0 + $0x230] sm:$0x7f]  ;;  %v79_v13 = vld [vmem:[%s1303_s0 + $0x238] sm:$0x7f] }
 0x10d   :  { %331 = vst.msk [vmem:[%s1304_s1 + $0x210] sm:$0x7f] %vm264_vm0, %v202_v6  ;;  %332 = vst.msk [vmem:[%s1304_s1 + $0x218] sm:$0x7f] %vm264_vm0, %v203_v7  ;;  %v206_v14 = vmax.f32 %v78_v12, 0.0  ;;  %v207_v15 = vmax.f32 %v79_v13, 0.0 }
 0x114   :  { %v80_v16 = vld [vmem:[%s1303_s0 + $0x240] sm:$0x7f]  ;;  %v81_v17 = vld [vmem:[%s1303_s0 + $0x248] sm:$0x7f] }
 0x115   :  { %333 = vst.msk [vmem:[%s1304_s1 + $0x220] sm:$0x7f] %vm264_vm0, %v204_v10  ;;  %334 = vst.msk [vmem:[%s1304_s1 + $0x228] sm:$0x7f] %vm264_vm0, %v205_v11  ;;  %v208_v18 = vmax.f32 %v80_v16, 0.0  ;;  %v209_v19 = vmax.f32 %v81_v17, 0.0 }
 0x11c   :  { %v82_v20 = vld [vmem:[%s1303_s0 + $0x250] sm:$0x7f]  ;;  %v83_v21 = vld [vmem:[%s1303_s0 + $0x258] sm:$0x7f] }
 0x11d   :  { %335 = vst.msk [vmem:[%s1304_s1 + $0x230] sm:$0x7f] %vm264_vm0, %v206_v14  ;;  %336 = vst.msk [vmem:[%s1304_s1 + $0x238] sm:$0x7f] %vm264_vm0, %v207_v15  ;;  %v210_v22 = vmax.f32 %v82_v20, 0.0  ;;  %v211_v23 = vmax.f32 %v83_v21, 0.0 }
 0x124   :  { %v84_v24 = vld [vmem:[%s1303_s0 + $0x260] sm:$0x7f]  ;;  %v85_v25 = vld [vmem:[%s1303_s0 + $0x268] sm:$0x7f] }
 0x125   :  { %337 = vst.msk [vmem:[%s1304_s1 + $0x240] sm:$0x7f] %vm264_vm0, %v208_v18  ;;  %338 = vst.msk [vmem:[%s1304_s1 + $0x248] sm:$0x7f] %vm264_vm0, %v209_v19  ;;  %v212_v26 = vmax.f32 %v84_v24, 0.0  ;;  %v213_v27 = vmax.f32 %v85_v25, 0.0 }
 0x12c   :  { %v86_v28 = vld [vmem:[%s1303_s0 + $0x270] sm:$0x7f]  ;;  %v87_v29 = vld [vmem:[%s1303_s0 + $0x278] sm:$0x7f] }
 0x12d   :  { %339 = vst.msk [vmem:[%s1304_s1 + $0x250] sm:$0x7f] %vm264_vm0, %v210_v22  ;;  %340 = vst.msk [vmem:[%s1304_s1 + $0x258] sm:$0x7f] %vm264_vm0, %v211_v23  ;;  %v214_v30 = vmax.f32 %v86_v28, 0.0  ;;  %v215_v31 = vmax.f32 %v87_v29, 0.0 }
 0x134   :  { %v88_v32 = vld [vmem:[%s1303_s0 + $0x280] sm:$0x7f]  ;;  %v89_v33 = vld [vmem:[%s1303_s0 + $0x288] sm:$0x7f] }
 0x135   :  { %341 = vst.msk [vmem:[%s1304_s1 + $0x260] sm:$0x7f] %vm264_vm0, %v212_v26  ;;  %342 = vst.msk [vmem:[%s1304_s1 + $0x268] sm:$0x7f] %vm264_vm0, %v213_v27  ;;  %v216_v34 = vmax.f32 %v88_v32, 0.0  ;;  %v217_v35 = vmax.f32 %v89_v33, 0.0 }
 0x13c   :  { %v90_v36 = vld [vmem:[%s1303_s0 + $0x290] sm:$0x7f]  ;;  %v91_v37 = vld [vmem:[%s1303_s0 + $0x298] sm:$0x7f] }
 0x13d   :  { %343 = vst.msk [vmem:[%s1304_s1 + $0x270] sm:$0x7f] %vm264_vm0, %v214_v30  ;;  %344 = vst.msk [vmem:[%s1304_s1 + $0x278] sm:$0x7f] %vm264_vm0, %v215_v31  ;;  %v218_v38 = vmax.f32 %v90_v36, 0.0  ;;  %v219_v39 = vmax.f32 %v91_v37, 0.0 }
 0x144   :  { %v92_v40 = vld [vmem:[%s1303_s0 + $0x2a0] sm:$0x7f]  ;;  %v93_v41 = vld [vmem:[%s1303_s0 + $0x2a8] sm:$0x7f] }
 0x145   :  { %345 = vst.msk [vmem:[%s1304_s1 + $0x280] sm:$0x7f] %vm264_vm0, %v216_v34  ;;  %346 = vst.msk [vmem:[%s1304_s1 + $0x288] sm:$0x7f] %vm264_vm0, %v217_v35  ;;  %v220_v42 = vmax.f32 %v92_v40, 0.0  ;;  %v221_v43 = vmax.f32 %v93_v41, 0.0 }
 0x14c   :  { %v94_v44 = vld [vmem:[%s1303_s0 + $0x2b0] sm:$0x7f]  ;;  %v95_v45 = vld [vmem:[%s1303_s0 + $0x2b8] sm:$0x7f] }
 0x14d   :  { %347 = vst.msk [vmem:[%s1304_s1 + $0x290] sm:$0x7f] %vm264_vm0, %v218_v38  ;;  %348 = vst.msk [vmem:[%s1304_s1 + $0x298] sm:$0x7f] %vm264_vm0, %v219_v39  ;;  %v222_v46 = vmax.f32 %v94_v44, 0.0  ;;  %v223_v47 = vmax.f32 %v95_v45, 0.0 }
 0x154   :  { %v96_v48 = vld [vmem:[%s1303_s0 + $0x2c0] sm:$0x7f]  ;;  %v97_v49 = vld [vmem:[%s1303_s0 + $0x2c8] sm:$0x7f] }
 0x155   :  { %349 = vst.msk [vmem:[%s1304_s1 + $0x2a0] sm:$0x7f] %vm264_vm0, %v220_v42  ;;  %350 = vst.msk [vmem:[%s1304_s1 + $0x2a8] sm:$0x7f] %vm264_vm0, %v221_v43  ;;  %v224_v50 = vmax.f32 %v96_v48, 0.0  ;;  %v225_v51 = vmax.f32 %v97_v49, 0.0 }
 0x15c   :  { %v98_v52 = vld [vmem:[%s1303_s0 + $0x2d0] sm:$0x7f]  ;;  %v99_v53 = vld [vmem:[%s1303_s0 + $0x2d8] sm:$0x7f] }
 0x15d   :  { %351 = vst.msk [vmem:[%s1304_s1 + $0x2b0] sm:$0x7f] %vm264_vm0, %v222_v46  ;;  %352 = vst.msk [vmem:[%s1304_s1 + $0x2b8] sm:$0x7f] %vm264_vm0, %v223_v47  ;;  %v226_v54 = vmax.f32 %v98_v52, 0.0  ;;  %v227_v55 = vmax.f32 %v99_v53, 0.0 }
 0x164   :  { %v100_v56 = vld [vmem:[%s1303_s0 + $0x2e0] sm:$0x7f]  ;;  %v101_v57 = vld [vmem:[%s1303_s0 + $0x2e8] sm:$0x7f] }
 0x165   :  { %353 = vst.msk [vmem:[%s1304_s1 + $0x2c0] sm:$0x7f] %vm264_vm0, %v224_v50  ;;  %354 = vst.msk [vmem:[%s1304_s1 + $0x2c8] sm:$0x7f] %vm264_vm0, %v225_v51  ;;  %v228_v58 = vmax.f32 %v100_v56, 0.0  ;;  %v229_v59 = vmax.f32 %v101_v57, 0.0 }
 0x16c   :  { %v102_v60 = vld [vmem:[%s1303_s0 + $0x2f0] sm:$0x7f]  ;;  %v103_v61 = vld [vmem:[%s1303_s0 + $0x2f8] sm:$0x7f] }
 0x16d   :  { %355 = vst.msk [vmem:[%s1304_s1 + $0x2d0] sm:$0x7f] %vm264_vm0, %v226_v54  ;;  %356 = vst.msk [vmem:[%s1304_s1 + $0x2d8] sm:$0x7f] %vm264_vm0, %v227_v55  ;;  %v230_v62 = vmax.f32 %v102_v60, 0.0  ;;  %v231_v63 = vmax.f32 %v103_v61, 0.0 }
 0x174   :  { %v104_v0 = vld [vmem:[%s1303_s0 + $0x300] sm:$0x7f]  ;;  %v105_v1 = vld [vmem:[%s1303_s0 + $0x308] sm:$0x7f] }
 0x175   :  { %357 = vst.msk [vmem:[%s1304_s1 + $0x2e0] sm:$0x7f] %vm264_vm0, %v228_v58  ;;  %358 = vst.msk [vmem:[%s1304_s1 + $0x2e8] sm:$0x7f] %vm264_vm0, %v229_v59  ;;  %v232_v2 = vmax.f32 %v104_v0, 0.0  ;;  %v233_v3 = vmax.f32 %v105_v1, 0.0 }
 0x17c   :  { %v106_v4 = vld [vmem:[%s1303_s0 + $0x310] sm:$0x7f]  ;;  %v107_v5 = vld [vmem:[%s1303_s0 + $0x318] sm:$0x7f] }
 0x17d   :  { %359 = vst.msk [vmem:[%s1304_s1 + $0x2f0] sm:$0x7f] %vm264_vm0, %v230_v62  ;;  %360 = vst.msk [vmem:[%s1304_s1 + $0x2f8] sm:$0x7f] %vm264_vm0, %v231_v63  ;;  %v234_v6 = vmax.f32 %v106_v4, 0.0  ;;  %v235_v7 = vmax.f32 %v107_v5, 0.0 }
 0x184   :  { %v108_v8 = vld [vmem:[%s1303_s0 + $0x320] sm:$0x7f]  ;;  %v109_v9 = vld [vmem:[%s1303_s0 + $0x328] sm:$0x7f] }
 0x185   :  { %361 = vst.msk [vmem:[%s1304_s1 + $0x300] sm:$0x7f] %vm264_vm0, %v232_v2  ;;  %362 = vst.msk [vmem:[%s1304_s1 + $0x308] sm:$0x7f] %vm264_vm0, %v233_v3  ;;  %v236_v10 = vmax.f32 %v108_v8, 0.0  ;;  %v237_v11 = vmax.f32 %v109_v9, 0.0 }
 0x18c   :  { %v110_v12 = vld [vmem:[%s1303_s0 + $0x330] sm:$0x7f]  ;;  %v111_v13 = vld [vmem:[%s1303_s0 + $0x338] sm:$0x7f] }
 0x18d   :  { %363 = vst.msk [vmem:[%s1304_s1 + $0x310] sm:$0x7f] %vm264_vm0, %v234_v6  ;;  %364 = vst.msk [vmem:[%s1304_s1 + $0x318] sm:$0x7f] %vm264_vm0, %v235_v7  ;;  %v238_v14 = vmax.f32 %v110_v12, 0.0  ;;  %v239_v15 = vmax.f32 %v111_v13, 0.0 }
 0x194   :  { %v112_v16 = vld [vmem:[%s1303_s0 + $0x340] sm:$0x7f]  ;;  %v113_v17 = vld [vmem:[%s1303_s0 + $0x348] sm:$0x7f] }
 0x195   :  { %365 = vst.msk [vmem:[%s1304_s1 + $0x320] sm:$0x7f] %vm264_vm0, %v236_v10  ;;  %366 = vst.msk [vmem:[%s1304_s1 + $0x328] sm:$0x7f] %vm264_vm0, %v237_v11  ;;  %v240_v18 = vmax.f32 %v112_v16, 0.0  ;;  %v241_v19 = vmax.f32 %v113_v17, 0.0 }
 0x19c   :  { %v114_v20 = vld [vmem:[%s1303_s0 + $0x350] sm:$0x7f]  ;;  %v115_v21 = vld [vmem:[%s1303_s0 + $0x358] sm:$0x7f] }
 0x19d   :  { %367 = vst.msk [vmem:[%s1304_s1 + $0x330] sm:$0x7f] %vm264_vm0, %v238_v14  ;;  %368 = vst.msk [vmem:[%s1304_s1 + $0x338] sm:$0x7f] %vm264_vm0, %v239_v15  ;;  %v242_v22 = vmax.f32 %v114_v20, 0.0  ;;  %v243_v23 = vmax.f32 %v115_v21, 0.0 }
 0x1a4   :  { %v116_v24 = vld [vmem:[%s1303_s0 + $0x360] sm:$0x7f]  ;;  %v117_v25 = vld [vmem:[%s1303_s0 + $0x368] sm:$0x7f] }
 0x1a5   :  { %369 = vst.msk [vmem:[%s1304_s1 + $0x340] sm:$0x7f] %vm264_vm0, %v240_v18  ;;  %370 = vst.msk [vmem:[%s1304_s1 + $0x348] sm:$0x7f] %vm264_vm0, %v241_v19  ;;  %v244_v26 = vmax.f32 %v116_v24, 0.0  ;;  %v245_v27 = vmax.f32 %v117_v25, 0.0 }
 0x1ac   :  { %v118_v28 = vld [vmem:[%s1303_s0 + $0x370] sm:$0x7f]  ;;  %v119_v29 = vld [vmem:[%s1303_s0 + $0x378] sm:$0x7f] }
 0x1ad   :  { %371 = vst.msk [vmem:[%s1304_s1 + $0x350] sm:$0x7f] %vm264_vm0, %v242_v22  ;;  %372 = vst.msk [vmem:[%s1304_s1 + $0x358] sm:$0x7f] %vm264_vm0, %v243_v23  ;;  %v246_v30 = vmax.f32 %v118_v28, 0.0  ;;  %v247_v31 = vmax.f32 %v119_v29, 0.0 }
 0x1b4   :  { %v120_v32 = vld [vmem:[%s1303_s0 + $0x380] sm:$0x7f]  ;;  %v121_v33 = vld [vmem:[%s1303_s0 + $0x388] sm:$0x7f] }
 0x1b5   :  { %373 = vst.msk [vmem:[%s1304_s1 + $0x360] sm:$0x7f] %vm264_vm0, %v244_v26  ;;  %374 = vst.msk [vmem:[%s1304_s1 + $0x368] sm:$0x7f] %vm264_vm0, %v245_v27  ;;  %v248_v34 = vmax.f32 %v120_v32, 0.0  ;;  %v249_v35 = vmax.f32 %v121_v33, 0.0 }
 0x1bc   :  { %v122_v36 = vld [vmem:[%s1303_s0 + $0x390] sm:$0x7f]  ;;  %v123_v37 = vld [vmem:[%s1303_s0 + $0x398] sm:$0x7f] }
 0x1bd   :  { %375 = vst.msk [vmem:[%s1304_s1 + $0x370] sm:$0x7f] %vm264_vm0, %v246_v30  ;;  %376 = vst.msk [vmem:[%s1304_s1 + $0x378] sm:$0x7f] %vm264_vm0, %v247_v31  ;;  %v250_v38 = vmax.f32 %v122_v36, 0.0  ;;  %v251_v39 = vmax.f32 %v123_v37, 0.0 }
 0x1c4   :  { %v124_v40 = vld [vmem:[%s1303_s0 + $0x3a0] sm:$0x7f]  ;;  %v125_v41 = vld [vmem:[%s1303_s0 + $0x3a8] sm:$0x7f] }
 0x1c5   :  { %377 = vst.msk [vmem:[%s1304_s1 + $0x380] sm:$0x7f] %vm264_vm0, %v248_v34  ;;  %378 = vst.msk [vmem:[%s1304_s1 + $0x388] sm:$0x7f] %vm264_vm0, %v249_v35  ;;  %v252_v42 = vmax.f32 %v124_v40, 0.0  ;;  %v253_v43 = vmax.f32 %v125_v41, 0.0 }
 0x1cc   :  { %v126_v44 = vld [vmem:[%s1303_s0 + $0x3b0] sm:$0x7f]  ;;  %v127_v45 = vld [vmem:[%s1303_s0 + $0x3b8] sm:$0x7f] }
 0x1cd   :  { %379 = vst.msk [vmem:[%s1304_s1 + $0x390] sm:$0x7f] %vm264_vm0, %v250_v38  ;;  %380 = vst.msk [vmem:[%s1304_s1 + $0x398] sm:$0x7f] %vm264_vm0, %v251_v39  ;;  %v254_v46 = vmax.f32 %v126_v44, 0.0  ;;  %v255_v47 = vmax.f32 %v127_v45, 0.0 }
 0x1d4   :  { %v128_v48 = vld [vmem:[%s1303_s0 + $0x3c0] sm:$0x7f]  ;;  %v129_v49 = vld [vmem:[%s1303_s0 + $0x3c8] sm:$0x7f] }
 0x1d5   :  { %381 = vst.msk [vmem:[%s1304_s1 + $0x3a0] sm:$0x7f] %vm264_vm0, %v252_v42  ;;  %382 = vst.msk [vmem:[%s1304_s1 + $0x3a8] sm:$0x7f] %vm264_vm0, %v253_v43  ;;  %v256_v50 = vmax.f32 %v128_v48, 0.0  ;;  %v257_v51 = vmax.f32 %v129_v49, 0.0 }
 0x1dc   :  { %v130_v52 = vld [vmem:[%s1303_s0 + $0x3d0] sm:$0x7f]  ;;  %v131_v53 = vld [vmem:[%s1303_s0 + $0x3d8] sm:$0x7f] }
 0x1dd   :  { %383 = vst.msk [vmem:[%s1304_s1 + $0x3b0] sm:$0x7f] %vm264_vm0, %v254_v46  ;;  %384 = vst.msk [vmem:[%s1304_s1 + $0x3b8] sm:$0x7f] %vm264_vm0, %v255_v47  ;;  %v258_v54 = vmax.f32 %v130_v52, 0.0  ;;  %v259_v55 = vmax.f32 %v131_v53, 0.0 }
 0x1e4   :  { %v132_v56 = vld [vmem:[%s1303_s0 + $0x3e0] sm:$0x7f]  ;;  %v133_v57 = vld [vmem:[%s1303_s0 + $0x3e8] sm:$0x7f] }
 0x1e5   :  { %385 = vst.msk [vmem:[%s1304_s1 + $0x3c0] sm:$0x7f] %vm264_vm0, %v256_v50  ;;  %386 = vst.msk [vmem:[%s1304_s1 + $0x3c8] sm:$0x7f] %vm264_vm0, %v257_v51  ;;  %v260_v58 = vmax.f32 %v132_v56, 0.0  ;;  %v261_v59 = vmax.f32 %v133_v57, 0.0 }
 0x1ec   :  { %v134_v60 = vld [vmem:[%s1303_s0 + $0x3f0] sm:$0x7f]  ;;  %v135_v61 = vld [vmem:[%s1303_s0 + $0x3f8] sm:$0x7f] }
 0x1ed   :  { %387 = vst.msk [vmem:[%s1304_s1 + $0x3d0] sm:$0x7f] %vm264_vm0, %v258_v54  ;;  %388 = vst.msk [vmem:[%s1304_s1 + $0x3d8] sm:$0x7f] %vm264_vm0, %v259_v55  ;;  %v262_v62 = vmax.f32 %v134_v60, 0.0  ;;  %v263_v63 = vmax.f32 %v135_v61, 0.0 }
 0x1ee   :  { %389 = vst.msk [vmem:[%s1304_s1 + $0x3e0] sm:$0x7f] %vm264_vm0, %v260_v58  ;;  %390 = vst.msk [vmem:[%s1304_s1 + $0x3e8] sm:$0x7f] %vm264_vm0, %v261_v59 }
 0x1ef   :  { %391 = vst.msk [vmem:[%s1304_s1 + $0x3f0] sm:$0x7f] %vm264_vm0, %v262_v62  ;;  %392 = vst.msk [vmem:[%s1304_s1 + $0x3f8] sm:$0x7f] %vm264_vm0, %v263_v63 }

</bundles_post_ra>
